<compile_context>
chip_gen: v7x
topology: tpu7x:2x2x1
jax: 0.10.0
libtpu: 0.0.40
codegen_flags: <defaults>
</compile_context>

<pallas_src>
from functools import partial

import numpy as np
import jax
import jax.numpy as jnp
from jax.experimental import pallas as pl
from jax.experimental.pallas import tpu as pltpu


def _round_up(x, m):
    return ((x + m - 1) // m) * m


# -----------------------------------------------------------------------------
# Pallas kernel: `batch_block` samples per grid step, channels-first math,
# taps built with lane rolls + boundary masks, bf16 MXU / f32 accumulation.
# -----------------------------------------------------------------------------
def _gated_masked_conv_kernel(
    xv_ref,      # (Bblk, Cp, HW)  bf16  vertical-stack input (channel-padded)
    xh_ref,      # (Bblk, Cp, HW)  bf16  horizontal-stack input
    vmask_ref,   # (6, Cp, HW)     f32   0/1 boundary masks per vertical tap
    wv_ref,      # (6, 2Cp, Cp)    bf16  masked 3x3 vertical taps (kh in {0,1})
    wh_ref,      # (2, 2Cp, Cp)    bf16  masked 1x3 horizontal taps (kw in {0,1})
    w11a_ref,    # (2Cp, 2Cp)      bf16  conv1x1_1
    w2_ref,      # (Cp, Cp)        bf16  conv1x1_2
    bias_ref,    # (2Cp, 3)        f32   columns: [bv | bh+b11a | b2 (padded)]
    ov_ref,      # (Bblk, Cp, HW)
    oh_ref,      # (Bblk, Cp, HW)
    *, cp, hw, bblk, v_shifts,
):
    f32, bf16 = jnp.float32, jnp.bfloat16

    # Hoisted once per grid step (shared across the Bblk samples).
    bv = bias_ref[:, 0:1]                        # (2Cp, 1)
    bhf = bias_ref[:, 1:2]                       # (2Cp, 1)  bh + b11a
    b2 = bias_ref[:cp, 2:3]                      # (Cp, 1)
    masks = [vmask_ref[t] for t in range(6)]     # each (Cp, HW) f32
    wv = [wv_ref[t] for t in range(6)]           # each (2Cp, Cp) bf16
    wh0, wh1 = wh_ref[0], wh_ref[1]
    w11a = w11a_ref[...]
    w2 = w2_ref[...]

    # Short static loop over the batch block (amortizes per-step overhead).
    # TODO(synk): switch to lax.fori_loop(..., unroll=True) if bblk grows.
    for i in range(bblk):
        x_v = xv_ref[i].astype(f32)              # (Cp, HW)
        x_h = xh_ref[i].astype(f32)              # (Cp, HW)

        # ---- vertical masked 3x3 conv: 6 taps via lane rolls (XLU) +
        #      precomputed masks; one (2Cp,Cp)x(Cp,HW) bf16 MXU matmul per
        #      tap, accumulated in f32.  No im2col, no concat copies.
        vert_acc = jnp.zeros((2 * cp, hw), f32)
        for t, s in enumerate(v_shifts):
            if s == 0:                           # center tap: no shift, no mask
                tap = x_v
            else:
                tap = pltpu.roll(x_v, s, axis=1) * masks[t]
            vert_acc = vert_acc + jnp.dot(
                wv[t], tap.astype(bf16), preferred_element_type=f32)
        vert_acc = vert_acc + bv                 # (2Cp, HW)

        # Gate (Cp is a multiple of 8 -> tile-aligned split).
        out_v = jnp.tanh(vert_acc[:cp]) * jax.nn.sigmoid(vert_acc[cp:])
        ov_ref[i] = out_v.astype(ov_ref.dtype)

        # ---- horizontal masked 1x3 conv + conv1x1_1(vert_conv):
        #      separate matmuls summed in f32 (no sublane-axis concat).
        h_acc = jnp.dot(w11a, vert_acc.astype(bf16), preferred_element_type=f32)
        tap_l = pltpu.roll(x_h, 1, axis=1) * masks[3]        # left neighbour
        h_acc = h_acc + jnp.dot(wh0, tap_l.astype(bf16),
                                preferred_element_type=f32)
        h_acc = h_acc + jnp.dot(wh1, x_h.astype(bf16),
                                preferred_element_type=f32)
        h_acc = h_acc + bhf

        out_hg = jnp.tanh(h_acc[:cp]) * jnp.tanh(h_acc[cp:])

        # ---- conv1x1_2 + residual (residual is the original horiz input).
        out_h = (jnp.dot(w2, out_hg.astype(bf16), preferred_element_type=f32)
                 + b2 + x_h)
        oh_ref[i] = out_h.astype(oh_ref.dtype)


# -----------------------------------------------------------------------------
# Wrapper: weight/bias packing, boundary masks, pallas_call.
# -----------------------------------------------------------------------------
@partial(jax.jit, static_argnames=("batch_block", "out_dtype"))
def gated_masked_conv(vert_x, horiz_x, params, *, batch_block=1,
                      out_dtype=jnp.float32):
    B, C, H, W = vert_x.shape
    HW = H * W
    Cp = _round_up(C, 8)                 # sublane-aligned channel padding
    assert B % batch_block == 0, "batch_block must divide batch"

    wv_m, bv, wh_m, bh, w11a, b11a, w11b, b11b = params
    assert wv_m.shape == (2 * C, C, 3, 3) and wh_m.shape == (2 * C, C, 1, 3), (
        "kernel hard-codes kernel_size=3, mask_center=False masked convs")

    # ---- weight packing into channel-padded bf16 matrices ------------------
    def pad_o2_i1(w):                    # (2C, C) -> (2Cp, Cp)
        out = jnp.zeros((2 * Cp, Cp), jnp.float32)
        out = out.at[:C, :C].set(w[:C])
        out = out.at[Cp:Cp + C, :C].set(w[C:])
        return out.astype(jnp.bfloat16)

    def pad_o2_i2(w):                    # (2C, 2C) -> (2Cp, 2Cp)
        out = jnp.zeros((2 * Cp, 2 * Cp), jnp.float32)
        out = out.at[:C, :C].set(w[:C, :C])
        out = out.at[:C, Cp:Cp + C].set(w[:C, C:])
        out = out.at[Cp:Cp + C, :C].set(w[C:, :C])
        out = out.at[Cp:Cp + C, Cp:Cp + C].set(w[C:, C:])
        return out.astype(jnp.bfloat16)

    def pad_o1_i1(w):                    # (C, C) -> (Cp, Cp)
        return jnp.zeros((Cp, Cp), jnp.float32).at[:C, :C].set(w).astype(
            jnp.bfloat16)

    def pad_b2(b):                       # (2C,) -> (2Cp,)
        return (jnp.zeros((2 * Cp,), jnp.float32)
                .at[:C].set(b[:C]).at[Cp:Cp + C].set(b[C:]))

    # vertical taps (kh, kw) in {0,1} x {0,1,2} -- kh=2 row is masked to zero
    wv_taps = jnp.stack([pad_o2_i1(wv_m[:, :, kh, kw])
                         for kh in range(2) for kw in range(3)], axis=0)
    # horizontal taps kw in {0,1} -- kw=2 is masked to zero
    wh_taps = jnp.stack([pad_o2_i1(wh_m[:, :, 0, kw]) for kw in range(2)],
                        axis=0)
    w11a_p = pad_o2_i2(w11a[:, :, 0, 0])
    w2_p = pad_o1_i1(w11b[:, :, 0, 0])
    biases = jnp.stack(
        [pad_b2(bv), pad_b2(bh + b11a),
         jnp.zeros((2 * Cp,), jnp.float32).at[:C].set(b11b)], axis=1)  # (2Cp,3)

    # ---- boundary masks for the rolled taps (compile-time constants) -------
    pos = np.arange(HW)
    row, col = pos // W, pos % W
    not_r0 = (row > 0).astype(np.float32)
    not_c0 = (col > 0).astype(np.float32)
    not_cw = (col < W - 1).astype(np.float32)
    vmask_rows = np.stack([not_r0 * not_c0, not_r0, not_r0 * not_cw,
                           not_c0, np.ones(HW, np.float32), not_cw], axis=0)
    vmask = jnp.asarray(
        np.ascontiguousarray(np.broadcast_to(vmask_rows[:, None, :],
                                             (6, Cp, HW))))

    # roll shifts for taps (kh,kw): result[p] = x[p - shift]
    v_shifts = (W + 1, W, W - 1, 1, 0, HW - 1)

    # ---- activations: channels-first (lanes = HW), bf16, channel-padded ----
    def pack_act(x):
        x = x.astype(jnp.bfloat16).reshape(B, C, HW)
        if Cp > C:
            x = jnp.pad(x, ((0, 0), (0, Cp - C), (0, 0)))
        return x

    xv = pack_act(vert_x)
    xh = pack_act(horiz_x)

    # ---- cost estimate & explicit VMEM budget -------------------------------
    out_isz = np.dtype(out_dtype).itemsize
    flops = 2 * B * HW * Cp * Cp * (6 * 2 + 2 * 2 + 2 * 2 + 1)
    transcendentals = 4 * B * Cp * HW
    w_bytes = int((wv_taps.size + wh_taps.size + w11a_p.size + w2_p.size) * 2
                  + (biases.size + vmask.size) * 4)
    bytes_accessed = int(2 * B * Cp * HW * 2 + 2 * B * Cp * HW * out_isz
                         + w_bytes)
    step_bytes = batch_block * Cp * HW * (2 * 2 + 2 * out_isz)
    vmem_limit = int(min(96 * 2**20,
                         max(8 * 2**20, 4 * step_bytes + 2 * w_bytes)))

    kernel = partial(_gated_masked_conv_kernel, cp=Cp, hw=HW,
                     bblk=batch_block, v_shifts=v_shifts)

    out_v, out_h = pl.pallas_call(
        kernel,
        out_shape=(
            jax.ShapeDtypeStruct((B, Cp, HW), out_dtype),
            jax.ShapeDtypeStruct((B, Cp, HW), out_dtype),
        ),
        grid_spec=pltpu.PrefetchScalarGridSpec(
            num_scalar_prefetch=0,
            grid=(B // batch_block,),
            in_specs=[
                pl.BlockSpec((batch_block, Cp, HW), lambda g: (g, 0, 0)),
                pl.BlockSpec((batch_block, Cp, HW), lambda g: (g, 0, 0)),
                pl.BlockSpec((6, Cp, HW), lambda g: (0, 0, 0)),
                pl.BlockSpec((6, 2 * Cp, Cp), lambda g: (0, 0, 0)),
                pl.BlockSpec((2, 2 * Cp, Cp), lambda g: (0, 0, 0)),
                pl.BlockSpec((2 * Cp, 2 * Cp), lambda g: (0, 0)),
                pl.BlockSpec((Cp, Cp), lambda g: (0, 0)),
                pl.BlockSpec((2 * Cp, 3), lambda g: (0, 0)),
            ],
            out_specs=[
                pl.BlockSpec((batch_block, Cp, HW), lambda g: (g, 0, 0)),
                pl.BlockSpec((batch_block, Cp, HW), lambda g: (g, 0, 0)),
            ],
        ),
        compiler_params=pltpu.CompilerParams(
            dimension_semantics=(pltpu.PARALLEL,),
            vmem_limit_bytes=vmem_limit),
        cost_estimate=pl.CostEstimate(
            flops=flops, transcendentals=transcendentals,
            bytes_accessed=bytes_accessed),
    )(xv, xh, vmask, wv_taps, wh_taps, w11a_p, w2_p, biases)

    # (B, Cp, HW) -> NCHW (pure slice + reshape, no transpose).
    out_v = out_v[:, :C].reshape(B, C, H, W)
    out_h = out_h[:, :C].reshape(B, C, H, W)
    return out_v, out_h


# -----------------------------------------------------------------------------
# Pure-JAX reference (NCHW, matches the PyTorch module) for validation.
# -----------------------------------------------------------------------------
def _conv2d_nchw(x, w, b, padding):
    out = jax.lax.conv_general_dilated(
        x, w, window_strides=(1, 1), padding=padding,
        dimension_numbers=("NCHW", "OIHW", "NCHW"))
    if b is not None:
        out = out + b[None, :, None, None]
    return out


def gated_masked_conv_ref(vert_x, horiz_x, params):
    wv_m, bv, wh_m, bh, w11a, b11a, w11b, b11b = params
    C = vert_x.shape[1]
    vert_conv_x = _conv2d_nchw(vert_x, wv_m, bv, ((1, 1), (1, 1)))
    v1, v2 = vert_conv_x[:, :C], vert_conv_x[:, C:]
    out_vert = jnp.tanh(v1) * jax.nn.sigmoid(v2)

    h = (_conv2d_nchw(horiz_x, wh_m, bh, ((0, 0), (1, 1)))
         + _conv2d_nchw(vert_conv_x, w11a, b11a, ((0, 0), (0, 0))))
    h1, h2 = h[:, :C], h[:, C:]
    out_h = jnp.tanh(h1) * jnp.tanh(h2)
    out_h = _conv2d_nchw(out_h, w11b, b11b, ((0, 0), (0, 0))) + horiz_x
    return out_vert, out_h


# -----------------------------------------------------------------------------
if __name__ == "__main__":
    B, C, H, W = 4, 4, 16, 16
    C2 = 2 * C
    K = 3

    key = jax.random.PRNGKey(0)
    keys = jax.random.split(key, 10)

    vert_x = jax.random.normal(keys[0], (B, C, H, W), jnp.float32)
    horiz_x = jax.random.normal(keys[1], (B, C, H, W), jnp.float32)

    # Deterministic synthetic parameters (PyTorch Conv2d weight layout OIHW).
    wv = 0.1 * jax.random.normal(keys[2], (C2, C, K, K), jnp.float32)
    bv = 0.1 * jax.random.normal(keys[3], (C2,), jnp.float32)
    wh = 0.1 * jax.random.normal(keys[4], (C2, C, 1, K), jnp.float32)
    bh = 0.1 * jax.random.normal(keys[5], (C2,), jnp.float32)
    w11a = 0.1 * jax.random.normal(keys[6], (C2, C2, 1, 1), jnp.float32)
    b11a = 0.1 * jax.random.normal(keys[7], (C2,), jnp.float32)
    w11b = 0.1 * jax.random.normal(keys[8], (C, C, 1, 1), jnp.float32)
    b11b = 0.1 * jax.random.normal(keys[9], (C,), jnp.float32)

    # Autoregressive masks (mask_center=False, kernel_size=3).
    mask_v = jnp.array([[1., 1., 1.], [1., 1., 1.], [0., 0., 0.]], jnp.float32)
    mask_h = jnp.array([[1., 1., 0.]], jnp.float32)
    wv_m = wv * mask_v[None, None, :, :]
    wh_m = wh * mask_h[None, None, :, :]

    params = (wv_m, bv, wh_m, bh, w11a, b11a, w11b, b11b)

    out_vert, out_horiz = gated_masked_conv(vert_x, horiz_x, params,
                                            batch_block=2)
    jax.block_until_ready((out_vert, out_horiz))

    ref_vert, ref_horiz = gated_masked_conv_ref(vert_x, horiz_x, params)
    assert out_vert.shape == (B, C, H, W) and out_horiz.shape == (B, C, H, W)
    # bf16 MXU operands (per perf review) -> bf16-appropriate tolerances.
    assert jnp.allclose(out_vert, ref_vert, rtol=5e-2, atol=5e-2)
    assert jnp.allclose(out_horiz, ref_horiz, rtol=5e-2, atol=5e-2)

    print("KERNEL_OK")
</pallas_src>

<mosaic_0001>
module attributes {stable_mosaic.version = 11 : i64} {
  func.func @_gated_masked_conv_kernel(%arg0: i32, %arg1: memref<2x8x256xbf16, #tpu.memory_space<vmem>>, %arg2: memref<2x8x256xbf16, #tpu.memory_space<vmem>>, %arg3: memref<6x8x256xf32, #tpu.memory_space<vmem>>, %arg4: memref<6x16x8xbf16, #tpu.memory_space<vmem>>, %arg5: memref<2x16x8xbf16, #tpu.memory_space<vmem>>, %arg6: memref<16x16xbf16, #tpu.memory_space<vmem>>, %arg7: memref<8x8xbf16, #tpu.memory_space<vmem>>, %arg8: memref<16x3xf32, #tpu.memory_space<vmem>>, %arg9: memref<2x8x256xf32, #tpu.memory_space<vmem>>, %arg10: memref<2x8x256xf32, #tpu.memory_space<vmem>>) attributes {dimension_semantics = [#tpu.dimension_semantics<parallel>], iteration_bounds = array<i64: 2>, scalar_prefetch = 0 : i64, scratch_operands = 0 : i64, tpu.core_type = #tpu.core_type<tc>, window_params = [{transform_indices = @transform_0, window_bounds = array<i64: 2, 8, 256>}, {transform_indices = @transform_1, window_bounds = array<i64: 2, 8, 256>}, {pipeline_mode = #tpu.pipeline_mode<synchronous>, transform_indices = @transform_2, window_bounds = array<i64: 6, 8, 256>}, {pipeline_mode = #tpu.pipeline_mode<synchronous>, transform_indices = @transform_3, window_bounds = array<i64: 6, 16, 8>}, {pipeline_mode = #tpu.pipeline_mode<synchronous>, transform_indices = @transform_4, window_bounds = array<i64: 2, 16, 8>}, {pipeline_mode = #tpu.pipeline_mode<synchronous>, transform_indices = @transform_5, window_bounds = array<i64: 16, 16>}, {pipeline_mode = #tpu.pipeline_mode<synchronous>, transform_indices = @transform_6, window_bounds = array<i64: 8, 8>}, {pipeline_mode = #tpu.pipeline_mode<synchronous>, transform_indices = @transform_7, window_bounds = array<i64: 16, 3>}, {transform_indices = @transform_8, window_bounds = array<i64: 2, 8, 256>}, {transform_indices = @transform_9, window_bounds = array<i64: 2, 8, 256>}]} {
    %c0 = arith.constant 0 : index
    %c0_0 = arith.constant 0 : index
    %0 = vector.load %arg8[%c0, %c0_0] : memref<16x3xf32, #tpu.memory_space<vmem>>, vector<16x1xf32>
    %c0_1 = arith.constant 0 : index
    %c1 = arith.constant 1 : index
    %1 = vector.load %arg8[%c0_1, %c1] : memref<16x3xf32, #tpu.memory_space<vmem>>, vector<16x1xf32>
    %c0_2 = arith.constant 0 : index
    %c2 = arith.constant 2 : index
    %2 = vector.load %arg8[%c0_2, %c2] : memref<16x3xf32, #tpu.memory_space<vmem>>, vector<8x1xf32>
    %c0_3 = arith.constant 0 : index
    %c0_4 = arith.constant 0 : index
    %c0_5 = arith.constant 0 : index
    %3 = vector.load %arg3[%c0_3, %c0_4, %c0_5] : memref<6x8x256xf32, #tpu.memory_space<vmem>>, vector<1x8x256xf32>
    %4 = vector.shape_cast %3 : vector<1x8x256xf32> to vector<8x256xf32>
    %c1_6 = arith.constant 1 : index
    %c0_7 = arith.constant 0 : index
    %c0_8 = arith.constant 0 : index
    %5 = vector.load %arg3[%c1_6, %c0_7, %c0_8] : memref<6x8x256xf32, #tpu.memory_space<vmem>>, vector<1x8x256xf32>
    %6 = vector.shape_cast %5 : vector<1x8x256xf32> to vector<8x256xf32>
    %c2_9 = arith.constant 2 : index
    %c0_10 = arith.constant 0 : index
    %c0_11 = arith.constant 0 : index
    %7 = vector.load %arg3[%c2_9, %c0_10, %c0_11] : memref<6x8x256xf32, #tpu.memory_space<vmem>>, vector<1x8x256xf32>
    %8 = vector.shape_cast %7 : vector<1x8x256xf32> to vector<8x256xf32>
    %c3 = arith.constant 3 : index
    %c0_12 = arith.constant 0 : index
    %c0_13 = arith.constant 0 : index
    %9 = vector.load %arg3[%c3, %c0_12, %c0_13] : memref<6x8x256xf32, #tpu.memory_space<vmem>>, vector<1x8x256xf32>
    %10 = vector.shape_cast %9 : vector<1x8x256xf32> to vector<8x256xf32>
    %c5 = arith.constant 5 : index
    %c0_14 = arith.constant 0 : index
    %c0_15 = arith.constant 0 : index
    %11 = vector.load %arg3[%c5, %c0_14, %c0_15] : memref<6x8x256xf32, #tpu.memory_space<vmem>>, vector<1x8x256xf32>
    %12 = vector.shape_cast %11 : vector<1x8x256xf32> to vector<8x256xf32>
    %c0_16 = arith.constant 0 : index
    %c0_17 = arith.constant 0 : index
    %c0_18 = arith.constant 0 : index
    %13 = vector.load %arg4[%c0_16, %c0_17, %c0_18] : memref<6x16x8xbf16, #tpu.memory_space<vmem>>, vector<1x16x8xbf16>
    %14 = vector.shape_cast %13 : vector<1x16x8xbf16> to vector<16x8xbf16>
    %c1_19 = arith.constant 1 : index
    %c0_20 = arith.constant 0 : index
    %c0_21 = arith.constant 0 : index
    %15 = vector.load %arg4[%c1_19, %c0_20, %c0_21] : memref<6x16x8xbf16, #tpu.memory_space<vmem>>, vector<1x16x8xbf16>
    %16 = vector.shape_cast %15 : vector<1x16x8xbf16> to vector<16x8xbf16>
    %c2_22 = arith.constant 2 : index
    %c0_23 = arith.constant 0 : index
    %c0_24 = arith.constant 0 : index
    %17 = vector.load %arg4[%c2_22, %c0_23, %c0_24] : memref<6x16x8xbf16, #tpu.memory_space<vmem>>, vector<1x16x8xbf16>
    %18 = vector.shape_cast %17 : vector<1x16x8xbf16> to vector<16x8xbf16>
    %c3_25 = arith.constant 3 : index
    %c0_26 = arith.constant 0 : index
    %c0_27 = arith.constant 0 : index
    %19 = vector.load %arg4[%c3_25, %c0_26, %c0_27] : memref<6x16x8xbf16, #tpu.memory_space<vmem>>, vector<1x16x8xbf16>
    %20 = vector.shape_cast %19 : vector<1x16x8xbf16> to vector<16x8xbf16>
    %c4 = arith.constant 4 : index
    %c0_28 = arith.constant 0 : index
    %c0_29 = arith.constant 0 : index
    %21 = vector.load %arg4[%c4, %c0_28, %c0_29] : memref<6x16x8xbf16, #tpu.memory_space<vmem>>, vector<1x16x8xbf16>
    %22 = vector.shape_cast %21 : vector<1x16x8xbf16> to vector<16x8xbf16>
    %c5_30 = arith.constant 5 : index
    %c0_31 = arith.constant 0 : index
    %c0_32 = arith.constant 0 : index
    %23 = vector.load %arg4[%c5_30, %c0_31, %c0_32] : memref<6x16x8xbf16, #tpu.memory_space<vmem>>, vector<1x16x8xbf16>
    %24 = vector.shape_cast %23 : vector<1x16x8xbf16> to vector<16x8xbf16>
    %c0_33 = arith.constant 0 : index
    %c0_34 = arith.constant 0 : index
    %c0_35 = arith.constant 0 : index
    %25 = vector.load %arg5[%c0_33, %c0_34, %c0_35] : memref<2x16x8xbf16, #tpu.memory_space<vmem>>, vector<1x16x8xbf16>
    %26 = vector.shape_cast %25 : vector<1x16x8xbf16> to vector<16x8xbf16>
    %c1_36 = arith.constant 1 : index
    %c0_37 = arith.constant 0 : index
    %c0_38 = arith.constant 0 : index
    %27 = vector.load %arg5[%c1_36, %c0_37, %c0_38] : memref<2x16x8xbf16, #tpu.memory_space<vmem>>, vector<1x16x8xbf16>
    %28 = vector.shape_cast %27 : vector<1x16x8xbf16> to vector<16x8xbf16>
    %c0_39 = arith.constant 0 : index
    %c0_40 = arith.constant 0 : index
    %29 = vector.load %arg6[%c0_39, %c0_40] : memref<16x16xbf16, #tpu.memory_space<vmem>>, vector<16x16xbf16>
    %c0_41 = arith.constant 0 : index
    %c0_42 = arith.constant 0 : index
    %30 = vector.load %arg7[%c0_41, %c0_42] : memref<8x8xbf16, #tpu.memory_space<vmem>>, vector<8x8xbf16>
    %c0_43 = arith.constant 0 : index
    %c0_44 = arith.constant 0 : index
    %c0_45 = arith.constant 0 : index
    %31 = vector.load %arg1[%c0_43, %c0_44, %c0_45] : memref<2x8x256xbf16, #tpu.memory_space<vmem>>, vector<1x8x256xbf16>
    %32 = vector.shape_cast %31 : vector<1x8x256xbf16> to vector<8x256xbf16>
    %33 = arith.extf %32 : vector<8x256xbf16> to vector<8x256xf32>
    %c0_46 = arith.constant 0 : index
    %c0_47 = arith.constant 0 : index
    %c0_48 = arith.constant 0 : index
    %34 = vector.load %arg2[%c0_46, %c0_47, %c0_48] : memref<2x8x256xbf16, #tpu.memory_space<vmem>>, vector<1x8x256xbf16>
    %35 = vector.shape_cast %34 : vector<1x8x256xbf16> to vector<8x256xbf16>
    %36 = arith.extf %35 : vector<8x256xbf16> to vector<8x256xf32>
    %cst = arith.constant 0.000000e+00 : f32
    %37 = vector.broadcast %cst : f32 to vector<16x256xf32>
    %c17_i32 = arith.constant 17 : i32
    %38 = tpu.dynamic_rotate %33 by %c17_i32 dim 1 : vector<8x256xf32>, i32 -> vector<8x256xf32>
    %39 = arith.mulf %38, %4 : vector<8x256xf32>
    %40 = arith.truncf %39 : vector<8x256xf32> to vector<8x256xbf16>
    %cst_49 = arith.constant dense<0.000000e+00> : vector<16x256xf32>
    %41 = tpu.matmul %14, %40, %cst_49 {dimension_numbers = #tpu.dot_dimension_numbers<[1], [0], [0], [1], [0, 0, 1, 1], [], []>} : vector<16x8xbf16>, vector<8x256xbf16>, vector<16x256xf32> -> vector<16x256xf32>
    %42 = arith.addf %37, %41 : vector<16x256xf32>
    %c16_i32 = arith.constant 16 : i32
    %43 = tpu.dynamic_rotate %33 by %c16_i32 dim 1 : vector<8x256xf32>, i32 -> vector<8x256xf32>
    %44 = arith.mulf %43, %6 : vector<8x256xf32>
    %45 = arith.truncf %44 : vector<8x256xf32> to vector<8x256xbf16>
    %cst_50 = arith.constant dense<0.000000e+00> : vector<16x256xf32>
    %46 = tpu.matmul %16, %45, %cst_50 {dimension_numbers = #tpu.dot_dimension_numbers<[1], [0], [0], [1], [0, 0, 1, 1], [], []>} : vector<16x8xbf16>, vector<8x256xbf16>, vector<16x256xf32> -> vector<16x256xf32>
    %47 = arith.addf %42, %46 : vector<16x256xf32>
    %c15_i32 = arith.constant 15 : i32
    %48 = tpu.dynamic_rotate %33 by %c15_i32 dim 1 : vector<8x256xf32>, i32 -> vector<8x256xf32>
    %49 = arith.mulf %48, %8 : vector<8x256xf32>
    %50 = arith.truncf %49 : vector<8x256xf32> to vector<8x256xbf16>
    %cst_51 = arith.constant dense<0.000000e+00> : vector<16x256xf32>
    %51 = tpu.matmul %18, %50, %cst_51 {dimension_numbers = #tpu.dot_dimension_numbers<[1], [0], [0], [1], [0, 0, 1, 1], [], []>} : vector<16x8xbf16>, vector<8x256xbf16>, vector<16x256xf32> -> vector<16x256xf32>
    %52 = arith.addf %47, %51 : vector<16x256xf32>
    %c1_i32 = arith.constant 1 : i32
    %53 = tpu.dynamic_rotate %33 by %c1_i32 dim 1 : vector<8x256xf32>, i32 -> vector<8x256xf32>
    %54 = arith.mulf %53, %10 : vector<8x256xf32>
    %55 = arith.truncf %54 : vector<8x256xf32> to vector<8x256xbf16>
    %cst_52 = arith.constant dense<0.000000e+00> : vector<16x256xf32>
    %56 = tpu.matmul %20, %55, %cst_52 {dimension_numbers = #tpu.dot_dimension_numbers<[1], [0], [0], [1], [0, 0, 1, 1], [], []>} : vector<16x8xbf16>, vector<8x256xbf16>, vector<16x256xf32> -> vector<16x256xf32>
    %57 = arith.addf %52, %56 : vector<16x256xf32>
    %58 = arith.truncf %33 : vector<8x256xf32> to vector<8x256xbf16>
    %cst_53 = arith.constant dense<0.000000e+00> : vector<16x256xf32>
    %59 = tpu.matmul %22, %58, %cst_53 {dimension_numbers = #tpu.dot_dimension_numbers<[1], [0], [0], [1], [0, 0, 1, 1], [], []>} : vector<16x8xbf16>, vector<8x256xbf16>, vector<16x256xf32> -> vector<16x256xf32>
    %60 = arith.addf %57, %59 : vector<16x256xf32>
    %c255_i32 = arith.constant 255 : i32
    %61 = tpu.dynamic_rotate %33 by %c255_i32 dim 1 : vector<8x256xf32>, i32 -> vector<8x256xf32>
    %62 = arith.mulf %61, %12 : vector<8x256xf32>
    %63 = arith.truncf %62 : vector<8x256xf32> to vector<8x256xbf16>
    %cst_54 = arith.constant dense<0.000000e+00> : vector<16x256xf32>
    %64 = tpu.matmul %24, %63, %cst_54 {dimension_numbers = #tpu.dot_dimension_numbers<[1], [0], [0], [1], [0, 0, 1, 1], [], []>} : vector<16x8xbf16>, vector<8x256xbf16>, vector<16x256xf32> -> vector<16x256xf32>
    %65 = arith.addf %60, %64 : vector<16x256xf32>
    %66 = vector.broadcast %0 : vector<16x1xf32> to vector<16x256xf32>
    %67 = arith.addf %65, %66 : vector<16x256xf32>
    %68 = vector.extract_strided_slice %67 {offsets = [0, 0], sizes = [8, 256], strides = [1, 1]} : vector<16x256xf32> to vector<8x256xf32>
    %69 = math.tanh %68 : vector<8x256xf32>
    %70 = vector.extract_strided_slice %67 {offsets = [8, 0], sizes = [8, 256], strides = [1, 1]} : vector<16x256xf32> to vector<8x256xf32>
    %71 = arith.negf %70 : vector<8x256xf32>
    %72 = math.exp %71 : vector<8x256xf32>
    %cst_55 = arith.constant 1.000000e+00 : f32
    %73 = vector.broadcast %cst_55 : f32 to vector<8x256xf32>
    %74 = arith.addf %73, %72 : vector<8x256xf32>
    %75 = arith.divf %73, %74 : vector<8x256xf32>
    %76 = arith.mulf %69, %75 : vector<8x256xf32>
    %c0_56 = arith.constant 0 : index
    %c0_57 = arith.constant 0 : index
    %c0_58 = arith.constant 0 : index
    %77 = vector.load %arg9[%c0_56, %c0_57, %c0_58] : memref<2x8x256xf32, #tpu.memory_space<vmem>>, vector<1x8x256xf32>
    %78 = vector.shape_cast %77 : vector<1x8x256xf32> to vector<8x256xf32>
    %79 = vector.shape_cast %76 : vector<8x256xf32> to vector<1x8x256xf32>
    tpu.vector_store %arg9[%c0_56, %c0_57, %c0_58], %79 {strides = array<i32>} : memref<2x8x256xf32, #tpu.memory_space<vmem>>, vector<1x8x256xf32>,
    %80 = arith.truncf %67 : vector<16x256xf32> to vector<16x256xbf16>
    %cst_59 = arith.constant dense<0.000000e+00> : vector<16x256xf32>
    %81 = tpu.matmul %29, %80, %cst_59 {dimension_numbers = #tpu.dot_dimension_numbers<[1], [0], [0], [1], [0, 0, 1, 1], [], []>} : vector<16x16xbf16>, vector<16x256xbf16>, vector<16x256xf32> -> vector<16x256xf32>
    %c1_i32_60 = arith.constant 1 : i32
    %82 = tpu.dynamic_rotate %36 by %c1_i32_60 dim 1 : vector<8x256xf32>, i32 -> vector<8x256xf32>
    %83 = arith.mulf %82, %10 : vector<8x256xf32>
    %84 = arith.truncf %83 : vector<8x256xf32> to vector<8x256xbf16>
    %cst_61 = arith.constant dense<0.000000e+00> : vector<16x256xf32>
    %85 = tpu.matmul %26, %84, %cst_61 {dimension_numbers = #tpu.dot_dimension_numbers<[1], [0], [0], [1], [0, 0, 1, 1], [], []>} : vector<16x8xbf16>, vector<8x256xbf16>, vector<16x256xf32> -> vector<16x256xf32>
    %86 = arith.addf %81, %85 : vector<16x256xf32>
    %87 = arith.truncf %36 : vector<8x256xf32> to vector<8x256xbf16>
    %cst_62 = arith.constant dense<0.000000e+00> : vector<16x256xf32>
    %88 = tpu.matmul %28, %87, %cst_62 {dimension_numbers = #tpu.dot_dimension_numbers<[1], [0], [0], [1], [0, 0, 1, 1], [], []>} : vector<16x8xbf16>, vector<8x256xbf16>, vector<16x256xf32> -> vector<16x256xf32>
    %89 = arith.addf %86, %88 : vector<16x256xf32>
    %90 = vector.broadcast %1 : vector<16x1xf32> to vector<16x256xf32>
    %91 = arith.addf %89, %90 : vector<16x256xf32>
    %92 = vector.extract_strided_slice %91 {offsets = [0, 0], sizes = [8, 256], strides = [1, 1]} : vector<16x256xf32> to vector<8x256xf32>
    %93 = math.tanh %92 : vector<8x256xf32>
    %94 = vector.extract_strided_slice %91 {offsets = [8, 0], sizes = [8, 256], strides = [1, 1]} : vector<16x256xf32> to vector<8x256xf32>
    %95 = math.tanh %94 : vector<8x256xf32>
    %96 = arith.mulf %93, %95 : vector<8x256xf32>
    %97 = arith.truncf %96 : vector<8x256xf32> to vector<8x256xbf16>
    %cst_63 = arith.constant dense<0.000000e+00> : vector<8x256xf32>
    %98 = tpu.matmul %30, %97, %cst_63 {dimension_numbers = #tpu.dot_dimension_numbers<[1], [0], [0], [1], [0, 0, 1, 1], [], []>} : vector<8x8xbf16>, vector<8x256xbf16>, vector<8x256xf32> -> vector<8x256xf32>
    %99 = vector.broadcast %2 : vector<8x1xf32> to vector<8x256xf32>
    %100 = arith.addf %98, %99 : vector<8x256xf32>
    %101 = arith.addf %100, %36 : vector<8x256xf32>
    %c0_64 = arith.constant 0 : index
    %c0_65 = arith.constant 0 : index
    %c0_66 = arith.constant 0 : index
    %102 = vector.load %arg10[%c0_64, %c0_65, %c0_66] : memref<2x8x256xf32, #tpu.memory_space<vmem>>, vector<1x8x256xf32>
    %103 = vector.shape_cast %102 : vector<1x8x256xf32> to vector<8x256xf32>
    %104 = vector.shape_cast %101 : vector<8x256xf32> to vector<1x8x256xf32>
    tpu.vector_store %arg10[%c0_64, %c0_65, %c0_66], %104 {strides = array<i32>} : memref<2x8x256xf32, #tpu.memory_space<vmem>>, vector<1x8x256xf32>,
    %c1_67 = arith.constant 1 : index
    %c0_68 = arith.constant 0 : index
    %c0_69 = arith.constant 0 : index
    %105 = vector.load %arg1[%c1_67, %c0_68, %c0_69] : memref<2x8x256xbf16, #tpu.memory_space<vmem>>, vector<1x8x256xbf16>
    %106 = vector.shape_cast %105 : vector<1x8x256xbf16> to vector<8x256xbf16>
    %107 = arith.extf %106 : vector<8x256xbf16> to vector<8x256xf32>
    %c1_70 = arith.constant 1 : index
    %c0_71 = arith.constant 0 : index
    %c0_72 = arith.constant 0 : index
    %108 = vector.load %arg2[%c1_70, %c0_71, %c0_72] : memref<2x8x256xbf16, #tpu.memory_space<vmem>>, vector<1x8x256xbf16>
    %109 = vector.shape_cast %108 : vector<1x8x256xbf16> to vector<8x256xbf16>
    %110 = arith.extf %109 : vector<8x256xbf16> to vector<8x256xf32>
    %cst_73 = arith.constant 0.000000e+00 : f32
    %111 = vector.broadcast %cst_73 : f32 to vector<16x256xf32>
    %c17_i32_74 = arith.constant 17 : i32
    %112 = tpu.dynamic_rotate %107 by %c17_i32_74 dim 1 : vector<8x256xf32>, i32 -> vector<8x256xf32>
    %113 = arith.mulf %112, %4 : vector<8x256xf32>
    %114 = arith.truncf %113 : vector<8x256xf32> to vector<8x256xbf16>
    %cst_75 = arith.constant dense<0.000000e+00> : vector<16x256xf32>
    %115 = tpu.matmul %14, %114, %cst_75 {dimension_numbers = #tpu.dot_dimension_numbers<[1], [0], [0], [1], [0, 0, 1, 1], [], []>} : vector<16x8xbf16>, vector<8x256xbf16>, vector<16x256xf32> -> vector<16x256xf32>
    %116 = arith.addf %111, %115 : vector<16x256xf32>
    %c16_i32_76 = arith.constant 16 : i32
    %117 = tpu.dynamic_rotate %107 by %c16_i32_76 dim 1 : vector<8x256xf32>, i32 -> vector<8x256xf32>
    %118 = arith.mulf %117, %6 : vector<8x256xf32>
    %119 = arith.truncf %118 : vector<8x256xf32> to vector<8x256xbf16>
    %cst_77 = arith.constant dense<0.000000e+00> : vector<16x256xf32>
    %120 = tpu.matmul %16, %119, %cst_77 {dimension_numbers = #tpu.dot_dimension_numbers<[1], [0], [0], [1], [0, 0, 1, 1], [], []>} : vector<16x8xbf16>, vector<8x256xbf16>, vector<16x256xf32> -> vector<16x256xf32>
    %121 = arith.addf %116, %120 : vector<16x256xf32>
    %c15_i32_78 = arith.constant 15 : i32
    %122 = tpu.dynamic_rotate %107 by %c15_i32_78 dim 1 : vector<8x256xf32>, i32 -> vector<8x256xf32>
    %123 = arith.mulf %122, %8 : vector<8x256xf32>
    %124 = arith.truncf %123 : vector<8x256xf32> to vector<8x256xbf16>
    %cst_79 = arith.constant dense<0.000000e+00> : vector<16x256xf32>
    %125 = tpu.matmul %18, %124, %cst_79 {dimension_numbers = #tpu.dot_dimension_numbers<[1], [0], [0], [1], [0, 0, 1, 1], [], []>} : vector<16x8xbf16>, vector<8x256xbf16>, vector<16x256xf32> -> vector<16x256xf32>
    %126 = arith.addf %121, %125 : vector<16x256xf32>
    %c1_i32_80 = arith.constant 1 : i32
    %127 = tpu.dynamic_rotate %107 by %c1_i32_80 dim 1 : vector<8x256xf32>, i32 -> vector<8x256xf32>
    %128 = arith.mulf %127, %10 : vector<8x256xf32>
    %129 = arith.truncf %128 : vector<8x256xf32> to vector<8x256xbf16>
    %cst_81 = arith.constant dense<0.000000e+00> : vector<16x256xf32>
    %130 = tpu.matmul %20, %129, %cst_81 {dimension_numbers = #tpu.dot_dimension_numbers<[1], [0], [0], [1], [0, 0, 1, 1], [], []>} : vector<16x8xbf16>, vector<8x256xbf16>, vector<16x256xf32> -> vector<16x256xf32>
    %131 = arith.addf %126, %130 : vector<16x256xf32>
    %132 = arith.truncf %107 : vector<8x256xf32> to vector<8x256xbf16>
    %cst_82 = arith.constant dense<0.000000e+00> : vector<16x256xf32>
    %133 = tpu.matmul %22, %132, %cst_82 {dimension_numbers = #tpu.dot_dimension_numbers<[1], [0], [0], [1], [0, 0, 1, 1], [], []>} : vector<16x8xbf16>, vector<8x256xbf16>, vector<16x256xf32> -> vector<16x256xf32>
    %134 = arith.addf %131, %133 : vector<16x256xf32>
    %c255_i32_83 = arith.constant 255 : i32
    %135 = tpu.dynamic_rotate %107 by %c255_i32_83 dim 1 : vector<8x256xf32>, i32 -> vector<8x256xf32>
    %136 = arith.mulf %135, %12 : vector<8x256xf32>
    %137 = arith.truncf %136 : vector<8x256xf32> to vector<8x256xbf16>
    %cst_84 = arith.constant dense<0.000000e+00> : vector<16x256xf32>
    %138 = tpu.matmul %24, %137, %cst_84 {dimension_numbers = #tpu.dot_dimension_numbers<[1], [0], [0], [1], [0, 0, 1, 1], [], []>} : vector<16x8xbf16>, vector<8x256xbf16>, vector<16x256xf32> -> vector<16x256xf32>
    %139 = arith.addf %134, %138 : vector<16x256xf32>
    %140 = vector.broadcast %0 : vector<16x1xf32> to vector<16x256xf32>
    %141 = arith.addf %139, %140 : vector<16x256xf32>
    %142 = vector.extract_strided_slice %141 {offsets = [0, 0], sizes = [8, 256], strides = [1, 1]} : vector<16x256xf32> to vector<8x256xf32>
    %143 = math.tanh %142 : vector<8x256xf32>
    %144 = vector.extract_strided_slice %141 {offsets = [8, 0], sizes = [8, 256], strides = [1, 1]} : vector<16x256xf32> to vector<8x256xf32>
    %145 = arith.negf %144 : vector<8x256xf32>
    %146 = math.exp %145 : vector<8x256xf32>
    %cst_85 = arith.constant 1.000000e+00 : f32
    %147 = vector.broadcast %cst_85 : f32 to vector<8x256xf32>
    %148 = arith.addf %147, %146 : vector<8x256xf32>
    %149 = arith.divf %147, %148 : vector<8x256xf32>
    %150 = arith.mulf %143, %149 : vector<8x256xf32>
    %c1_86 = arith.constant 1 : index
    %c0_87 = arith.constant 0 : index
    %c0_88 = arith.constant 0 : index
    %151 = vector.load %arg9[%c1_86, %c0_87, %c0_88] : memref<2x8x256xf32, #tpu.memory_space<vmem>>, vector<1x8x256xf32>
    %152 = vector.shape_cast %151 : vector<1x8x256xf32> to vector<8x256xf32>
    %153 = vector.shape_cast %150 : vector<8x256xf32> to vector<1x8x256xf32>
    tpu.vector_store %arg9[%c1_86, %c0_87, %c0_88], %153 {strides = array<i32>} : memref<2x8x256xf32, #tpu.memory_space<vmem>>, vector<1x8x256xf32>,
    %154 = arith.truncf %141 : vector<16x256xf32> to vector<16x256xbf16>
    %cst_89 = arith.constant dense<0.000000e+00> : vector<16x256xf32>
    %155 = tpu.matmul %29, %154, %cst_89 {dimension_numbers = #tpu.dot_dimension_numbers<[1], [0], [0], [1], [0, 0, 1, 1], [], []>} : vector<16x16xbf16>, vector<16x256xbf16>, vector<16x256xf32> -> vector<16x256xf32>
    %c1_i32_90 = arith.constant 1 : i32
    %156 = tpu.dynamic_rotate %110 by %c1_i32_90 dim 1 : vector<8x256xf32>, i32 -> vector<8x256xf32>
    %157 = arith.mulf %156, %10 : vector<8x256xf32>
    %158 = arith.truncf %157 : vector<8x256xf32> to vector<8x256xbf16>
    %cst_91 = arith.constant dense<0.000000e+00> : vector<16x256xf32>
    %159 = tpu.matmul %26, %158, %cst_91 {dimension_numbers = #tpu.dot_dimension_numbers<[1], [0], [0], [1], [0, 0, 1, 1], [], []>} : vector<16x8xbf16>, vector<8x256xbf16>, vector<16x256xf32> -> vector<16x256xf32>
    %160 = arith.addf %155, %159 : vector<16x256xf32>
    %161 = arith.truncf %110 : vector<8x256xf32> to vector<8x256xbf16>
    %cst_92 = arith.constant dense<0.000000e+00> : vector<16x256xf32>
    %162 = tpu.matmul %28, %161, %cst_92 {dimension_numbers = #tpu.dot_dimension_numbers<[1], [0], [0], [1], [0, 0, 1, 1], [], []>} : vector<16x8xbf16>, vector<8x256xbf16>, vector<16x256xf32> -> vector<16x256xf32>
    %163 = arith.addf %160, %162 : vector<16x256xf32>
    %164 = vector.broadcast %1 : vector<16x1xf32> to vector<16x256xf32>
    %165 = arith.addf %163, %164 : vector<16x256xf32>
    %166 = vector.extract_strided_slice %165 {offsets = [0, 0], sizes = [8, 256], strides = [1, 1]} : vector<16x256xf32> to vector<8x256xf32>
    %167 = math.tanh %166 : vector<8x256xf32>
    %168 = vector.extract_strided_slice %165 {offsets = [8, 0], sizes = [8, 256], strides = [1, 1]} : vector<16x256xf32> to vector<8x256xf32>
    %169 = math.tanh %168 : vector<8x256xf32>
    %170 = arith.mulf %167, %169 : vector<8x256xf32>
    %171 = arith.truncf %170 : vector<8x256xf32> to vector<8x256xbf16>
    %cst_93 = arith.constant dense<0.000000e+00> : vector<8x256xf32>
    %172 = tpu.matmul %30, %171, %cst_93 {dimension_numbers = #tpu.dot_dimension_numbers<[1], [0], [0], [1], [0, 0, 1, 1], [], []>} : vector<8x8xbf16>, vector<8x256xbf16>, vector<8x256xf32> -> vector<8x256xf32>
    %173 = vector.broadcast %2 : vector<8x1xf32> to vector<8x256xf32>
    %174 = arith.addf %172, %173 : vector<8x256xf32>
    %175 = arith.addf %174, %110 : vector<8x256xf32>
    %c1_94 = arith.constant 1 : index
    %c0_95 = arith.constant 0 : index
    %c0_96 = arith.constant 0 : index
    %176 = vector.load %arg10[%c1_94, %c0_95, %c0_96] : memref<2x8x256xf32, #tpu.memory_space<vmem>>, vector<1x8x256xf32>
    %177 = vector.shape_cast %176 : vector<1x8x256xf32> to vector<8x256xf32>
    %178 = vector.shape_cast %175 : vector<8x256xf32> to vector<1x8x256xf32>
    tpu.vector_store %arg10[%c1_94, %c0_95, %c0_96], %178 {strides = array<i32>} : memref<2x8x256xf32, #tpu.memory_space<vmem>>, vector<1x8x256xf32>,
    return
  }
  func.func @transform_0(%arg0: i32) -> (i32, i32, i32) {
    %c0_i32 = arith.constant 0 : i32
    %c0_i32_0 = arith.constant 0 : i32
    %c0_i32_1 = arith.constant 0 : i32
    return %arg0, %c0_i32, %c0_i32_0 : i32, i32, i32
  }
  func.func @transform_1(%arg0: i32) -> (i32, i32, i32) {
    %c0_i32 = arith.constant 0 : i32
    %c0_i32_0 = arith.constant 0 : i32
    %c0_i32_1 = arith.constant 0 : i32
    return %arg0, %c0_i32, %c0_i32_0 : i32, i32, i32
  }
  func.func @transform_2(%arg0: i32) -> (i32, i32, i32) {
    %c0_i32 = arith.constant 0 : i32
    %c0_i32_0 = arith.constant 0 : i32
    %c0_i32_1 = arith.constant 0 : i32
    %c0_i32_2 = arith.constant 0 : i32
    return %c0_i32, %c0_i32_0, %c0_i32_1 : i32, i32, i32
  }
  func.func @transform_3(%arg0: i32) -> (i32, i32, i32) {
    %c0_i32 = arith.constant 0 : i32
    %c0_i32_0 = arith.constant 0 : i32
    %c0_i32_1 = arith.constant 0 : i32
    %c0_i32_2 = arith.constant 0 : i32
    return %c0_i32, %c0_i32_0, %c0_i32_1 : i32, i32, i32
  }
  func.func @transform_4(%arg0: i32) -> (i32, i32, i32) {
    %c0_i32 = arith.constant 0 : i32
    %c0_i32_0 = arith.constant 0 : i32
    %c0_i32_1 = arith.constant 0 : i32
    %c0_i32_2 = arith.constant 0 : i32
    return %c0_i32, %c0_i32_0, %c0_i32_1 : i32, i32, i32
  }
  func.func @transform_5(%arg0: i32) -> (i32, i32) {
    %c0_i32 = arith.constant 0 : i32
    %c0_i32_0 = arith.constant 0 : i32
    %c0_i32_1 = arith.constant 0 : i32
    return %c0_i32, %c0_i32_0 : i32, i32
  }
  func.func @transform_6(%arg0: i32) -> (i32, i32) {
    %c0_i32 = arith.constant 0 : i32
    %c0_i32_0 = arith.constant 0 : i32
    %c0_i32_1 = arith.constant 0 : i32
    return %c0_i32, %c0_i32_0 : i32, i32
  }
  func.func @transform_7(%arg0: i32) -> (i32, i32) {
    %c0_i32 = arith.constant 0 : i32
    %c0_i32_0 = arith.constant 0 : i32
    %c0_i32_1 = arith.constant 0 : i32
    return %c0_i32, %c0_i32_0 : i32, i32
  }
  func.func @transform_8(%arg0: i32) -> (i32, i32, i32) {
    %c0_i32 = arith.constant 0 : i32
    %c0_i32_0 = arith.constant 0 : i32
    %c0_i32_1 = arith.constant 0 : i32
    return %arg0, %c0_i32, %c0_i32_0 : i32, i32, i32
  }
  func.func @transform_9(%arg0: i32) -> (i32, i32, i32) {
    %c0_i32 = arith.constant 0 : i32
    %c0_i32_0 = arith.constant 0 : i32
    %c0_i32_1 = arith.constant 0 : i32
    return %arg0, %c0_i32, %c0_i32_0 : i32, i32, i32
  }
}

</mosaic_0001>

<bundles_post_ra>
// kernel: gated_masked_conv.1
= control target key start
LH: loop header
LB: loop body
LE: loop exit
PB: predicated region body
PF: predicated region fallthrough
CT: control target
= control target key end

     0   :  { %s2245_s30 = smov 0   ;;  %s2678_s0 = inlined_call_operand.vmem [shape: bf16[4,8,256], index: 0, kind: input, shape index: {}]   ;;  %s2679_s1 = inlined_call_operand.vmem [shape: bf16[4,8,256], index: 1, kind: input, shape index: {}]   ;;  %s2680_s2 = inlined_call_operand.vmem [shape: f32[6,8,256], index: 2, kind: input, shape index: {}]   ;;  %s2681_s3 = inlined_call_operand.vmem [shape: bf16[6,16,8], index: 3, kind: input, shape index: {}]   ;;  %s2682_s4 = inlined_call_operand.vmem [shape: bf16[2,16,8], index: 4, kind: input, shape index: {}]   ;;  %s2683_s5 = inlined_call_operand.vmem [shape: bf16[16,16], index: 5, kind: input, shape index: {}]   ;;  %s2684_s6 = inlined_call_operand.vmem [shape: bf16[8,8], index: 6, kind: input, shape index: {}]   ;;  %s2685_s7 = inlined_call_operand.vmem [shape: f32[16,3], index: 7, kind: input, shape index: {}]   ;;  %s2686_s8 = inlined_call_operand.vmem [shape: f32[4,8,256], index: 8, kind: output, shape index: {0}]   ;;  %s2687_s9 = inlined_call_operand.vmem [shape: f32[4,8,256], index: 9, kind: output, shape index: {1}]  }
   0x1 LB: > { %s1877_s10 = sadd.s32 4294967295, %s2185_s30   ;;  %p1881_p0 = scmp.ge.s32.totalorder %s2185_s30, 1  ;;  %s2185_s30 = sphi %s2245_s30, %s20_s30  }
   0x2   : > { %p304_p1 = scmp.lt.s32.totalorder %s2185_s30, 3 }
   0x4   : > { %p305_p2 = pnand %p1881_p0, %p304_p1 }
   0x5   : > { %s1882_s11 = sshll.u32 (!%p305_p2), %s1877_s10, 1  ;;  %v2187_v3 = vmov (!%p305_p2), 0   ;;  %s2188_s16 = smov (!%p305_p2), 16   ;;  %v2283_v5 = vld [vmem:[%s2685_s7] sm:$0xff] (!%p305_p2)  ;;  %v2299_v10 = vld [vmem:[%s2685_s7 + $0x8] sm:$0xff] (!%p305_p2)  ;;  %v434_v11 = vlaneseq (!%p305_p2)  ;;  %v2309_v17 = vld [vmem:[%s2680_s2 + $0x18] sm:$0xff] (!%p305_p2) }
   0x6   : > { %308 = sbr.rel (%p305_p2) target bundleno = 1435 (0x59b), region = 52  ;;  %p355_p3 = scmp.lt.s32.totalorder (!%p305_p2), %s1882_s11, 3  ;;  %502 = vmatprep.mubr.bf16.mxu0 (!%p305_p2), %v2187_v3  ;;  %2087 = vset.pattern.permute.xlu0 (!%p305_p2), %v2187_v3  ;;  %v2314_v18 = vld [vmem:[%s2680_s2 + $0x10] sm:$0xff] (!%p305_p2)  ;;  %v2323_v23 = vld [vmem:[%s2680_s2 + $0x28] sm:$0xff] (!%p305_p2)  ;;  %vm463_vm3 = vcmask (!%p305_p2), 1043456   ;;  %v2338_v31 = vld [vmem:[%s2680_s2] sm:$0xff] (!%p305_p2) }
   0x7   : > { %2088 = vset.pattern.permute.xlu1 (!%p305_p2), %v2187_v3  ;;  %942 = vmatprep.mubr.bf16.mxu1 (!%p305_p2), %v2187_v3  ;;  %s2189_s17 = smov (!%p305_p2), 15   ;;  %s2190_s18 = smov (!%p305_p2), 17   ;;  %v2302_v12 = vand.u32 (!%p305_p2), 127, %v434_v11  ;;  %v2333_v28 = vld [vmem:[%s2680_s2 + $0x8] sm:$0xff] (!%p305_p2)  ;;  %vm459_vm4 = vcmask (!%p305_p2), 64512   ;;  %v2359_v46 = vld [vmem:[%s2680_s2 + $0x20] sm:$0xff] (!%p305_p2) }
   0x8   : > { %s2191_s19 = smov (!%p305_p2), 1   ;;  %s2192_s20 = smov (!%p305_p2), 127   ;;  %v2351_v39 = vld [vmem:[%s2681_s3 + $0x8] sm:$0xff] (!%p305_p2)   ;;  %v2372_v51 = vld [vmem:[%s2680_s2 + $0x38] sm:$0xff] (!%p305_p2)  ;;  %v2380_v55 = vld [vmem:[%s2681_s3] sm:$0xff] (!%p305_p2)   ;;  %vm958_vm7 = vcmask (!%p305_p2), 130048  }
   0x9   : > { %vm447_vm0 = vcmp.lt.s32.totalorder (!%p305_p2), %v2302_v12, 16  ;;  %vm574_vm1 = vcmp.lt.s32.totalorder (!%p305_p2), %v2302_v12, 15  ;;  %vm436_vm2 = vcmp.lt.s32.totalorder (!%p305_p2), %v2302_v12, 17  ;;  %vm646_vm5 = vcmp.lt.s32.totalorder (!%p305_p2), %v2302_v12, 1  ;;  %v2388_v59 = vld [vmem:[%s2680_s2 + $0x30] sm:$0xff] (!%p305_p2)  ;;  %v2411_v11 = vld [vmem:[%s2680_s2 + $0x58] sm:$0xff] (!%p305_p2) }
   0xa   : > { %v2398_v62 = vld [vmem:[%s2681_s3 + $0x10] sm:$0xff] (!%p305_p2)   ;;  %vm784_vm6 = vcmp.lt.s32.totalorder (!%p305_p2), %v2302_v12, 127 }
   0xd   : > { %s2689_s11 = smov (!%p355_p3, %s1882_s11), 3 }
   0xe   : > { %s1981_s12 = sshll.u32 %s2689_s11, 3 }
   0xf   : > { %s2259_s15 = scalar_lea.vmem %s2678_s0, %s1981_s12  ;;  %s2278_s23 = scalar_lea.vmem %s2679_s1, %s1981_s12 }
  0x10   : > { %v2262_v0 = vld [vmem:[%s2259_s15] sm:$0xff] }
  0x11   : > { %v425_v1 = vunpack.c.l.bf16 %v2262_v0  ;;  %v426_v2 = vunpack.c.h.bf16 %v2262_v0  ;;  %v2286_v6 = vld [vmem:[%s2278_s23] sm:$0xff] }
  0x12   : > { %v428_v7 = vunpack.c.l.bf16 %v2286_v6  ;;  %v429_v8 = vunpack.c.h.bf16 %v2286_v6 }
  0x13   : > { %v2057_v4 = vpack.i.bf16 %v426_v2, %v425_v1  ;;  %v1928_v2 = vcombine.high %v2262_v0, %v2262_v0 }
  0x14   : > { %v2082_v9 = vpack.i.bf16 %v429_v8, %v428_v7 }
  0x15   : > { %2058 = vrot.lane.b32.xlu0 %v2057_v4, %s2188_s16  ;;  %2068 = vrot.lane.b32.xlu1 %v2057_v4, %s2189_s17 }
  0x19   : > { %2063 = vrot.lane.b32.xlu0 %v2057_v4, %s2190_s18  ;;  %2073 = vrot.lane.b32.xlu1 %v2057_v4, %s2191_s19 }
  0x1d   : > { %2078 = vrot.lane.b32.xlu0 %v2057_v4, %s2192_s20  ;;  %2083 = vrot.lane.b32.xlu1 %v2082_v9, %s2191_s19 }
  0x21   : > { %854 = vperm.xlu0 %2087, %v2283_v5   ;;  %859 = vperm.xlu1 %2088, %v2299_v10  }
  0x87   : > { %v2059_v13 = vpop.permute.xlu0 %2058  ;;  %v2069_v14 = vpop.permute.xlu1 %2068 }
  0x88   : > { %v2061_v15 = vunpack.i.h.bf16 %v2059_v13  ;;  %v2060_v16 = vunpack.i.l.bf16 %v2059_v13  ;;  %v2071_v19 = vunpack.i.h.bf16 %v2069_v14  ;;  %v2070_v20 = vunpack.i.l.bf16 %v2069_v14 }
  0x89   : > { %v1927_v14 = vcombine.low %v2262_v0, %v2262_v0 }
  0x8a   : > { %v448_v21 = vsel %vm447_vm0, %v2060_v16, %v2061_v15  ;;  %v449_v22 = vsel %vm447_vm0, %v2061_v15, %v2060_v16  ;;  %v575_v24 = vsel %vm574_vm1, %v2070_v20, %v2071_v19  ;;  %v576_v45 = vsel %vm574_vm1, %v2071_v19, %v2070_v20  ;;  %v2421_v16 = vld [vmem:[%s2681_s3 + $0x18] sm:$0xff]  }
  0x8b   : > { %v451_v25 = vmul.f32 %v2309_v17, %v448_v21  ;;  %v450_v26 = vmul.f32 %v2314_v18, %v449_v22  ;;  %v2064_v27 = vpop.permute.xlu0 %2063  ;;  %v578_v34 = vmul.f32 %v2323_v23, %v575_v24  ;;  %v2074_v41 = vpop.permute.xlu1 %2073  ;;  %v577_v50 = vmul.f32 %v2359_v46, %v576_v45  ;;  %v2429_v22 = vld [vmem:[%s2680_s2 + $0x50] sm:$0xff] }
  0x8c   : > { %v2066_v29 = vunpack.i.h.bf16 %v2064_v27  ;;  %v2065_v30 = vunpack.i.l.bf16 %v2064_v27  ;;  %v2076_v47 = vunpack.i.h.bf16 %v2074_v41  ;;  %v2075_v48 = vunpack.i.l.bf16 %v2074_v41  ;;  %v2463_v41 = vld [vmem:[%s2682_s4] sm:$0xff]  }
  0x8d   : > { %v453_v32 = vpack.c.bf16 %v451_v25, %v451_v25  ;;  %v452_v33 = vpack.c.bf16 %v450_v26, %v450_v26  ;;  %v580_v44 = vpack.c.bf16 %v578_v34, %v578_v34  ;;  %v579_v53 = vpack.c.bf16 %v577_v50, %v577_v50  ;;  %v2439_v25 = vld [vmem:[%s2681_s3 + $0x20] sm:$0xff]   ;;  %v2452_v34 = vld [vmem:[%s2681_s3 + $0x28] sm:$0xff]  }
  0x8e   : > { %v437_v35 = vsel %vm436_vm2, %v2065_v30, %v2066_v29  ;;  %v438_v36 = vsel %vm436_vm2, %v2066_v29, %v2065_v30  ;;  %v647_v52 = vsel %vm646_vm5, %v2075_v48, %v2076_v47  ;;  %v648_v58 = vsel %vm646_vm5, %v2076_v47, %v2075_v48 }
  0x8f   : > { %1915 = vmatprep.subr.msk.bf16.mxu0 %vm463_vm3, %v453_v32  ;;  %v465_v37 = vsel %vm463_vm3, %v452_v33, 0  ;;  %v440_v38 = vmul.f32 %v437_v35, %v2333_v28  ;;  %v439_v40 = vmul.f32 %v438_v36, %v2338_v31  ;;  %v650_v54 = vmul.f32 %v2372_v51, %v647_v52  ;;  %v2079_v63 = vpop.permute.xlu0 %2078  ;;  %v2084_v27 = vpop.permute.xlu1 %2083 }
  0x90   : > { %471 = vmatpush1.bf16.msra.mxu0 %v465_v37  ;;  %v590_v56 = vsel %vm463_vm3, %v579_v53, 0  ;;  %v649_v60 = vmul.f32 %v2388_v59, %v648_v58  ;;  %v2081_v4 = vunpack.i.h.bf16 %v2079_v63  ;;  %v2080_v9 = vunpack.i.l.bf16 %v2079_v63 }
  0x91   : > { %v442_v42 = vpack.c.bf16 %v440_v38, %v440_v38  ;;  %v441_v43 = vpack.c.bf16 %v439_v40, %v439_v40  ;;  %v652_v57 = vpack.c.bf16 %v650_v54, %v650_v54  ;;  %v728_v19 = vsel %vm463_vm3, %v1927_v14, 0 }
  0x92   : > { %v651_v61 = vpack.c.bf16 %v649_v60, %v649_v60  ;;  %v786_v13 = vsel %vm784_vm6, %v2081_v4, %v2080_v9  ;;  %v785_v21 = vsel %vm784_vm6, %v2080_v9, %v2081_v4  ;;  %v2086_v29 = vunpack.i.h.bf16 %v2084_v27  ;;  %v2496_v9 = vld [vmem:[%s2683_s5] sm:$0xff]  }
  0x93   : > { %1916 = vmatmul.mubr.msk.bf16.vlgmr.msra.gmra.mrb[0].mxu0 %vm459_vm4, %v2351_v39  ;;  %1918 = vmatprep.subr.msk.bf16.mxu0 %vm463_vm3, %v442_v42  ;;  %v522_v49 = vsel %vm463_vm3, %v441_v43, 0  ;;  %v788_v15 = vmul.f32 %v2411_v11, %v786_v13  ;;  %v787_v0 = vmul.f32 %v2429_v22, %v785_v21  ;;  %v2085_v30 = vunpack.i.l.bf16 %v2084_v27  ;;  %v2470_v42 = vld [vmem:[%s2259_s15 + $0x8] sm:$0xff] }
  0x94   : > { %528 = vmatpush1.bf16.msra.mxu0 %v522_v49  ;;  %559 = vmatprep.mubr.bf16.mxu0 %v2187_v3  ;;  %v662_v1 = vsel %vm463_vm3, %v651_v61, 0  ;;  %v1151_v43 = vunpack.c.l.bf16 %v2470_v42  ;;  %v2193_v45 = vmov 1   ;;  %v1942_v4 = vcombine.low %v2286_v6, %v2286_v6  ;;  %v2506_v21 = vld [vmem:[%s2682_s4 + $0x8] sm:$0xff]  }
  0x95   : > { %1921 = vmatprep.subr.msk.bf16.mxu0 %vm463_vm3, %v580_v44  ;;  %v790_v20 = vpack.c.bf16 %v788_v15, %v788_v15  ;;  %v789_v24 = vpack.c.bf16 %v787_v0, %v787_v0  ;;  %v890_v32 = vsel %vm646_vm5, %v2085_v30, %v2086_v29  ;;  %v891_v33 = vsel %vm646_vm5, %v2086_v29, %v2085_v30 }
  0x96   : > { %v893_v35 = vmul.f32 %v2372_v51, %v890_v32  ;;  %v892_v36 = vmul.f32 %v2388_v59, %v891_v33  ;;  %v1152_v44 = vunpack.c.h.bf16 %v2470_v42  ;;  %2089 = vset.pattern.permute.xlu1 %v2193_v45  ;;  %2090 = vset.pattern.permute.xlu0 %v2193_v45  ;;  %v1019_v13 = vsel %vm463_vm3, %v1942_v4, 0  ;;  %v2522_v32 = vld [vmem:[%s2278_s23 + $0x8] sm:$0xff] }
  0x97   : > { %v800_v26 = vsel %vm463_vm3, %v789_v24, 0  ;;  %1072 = vperm.xlu1 %2089, %v2283_v5   ;;  %1076 = vperm.xlu0 %2090, %v2299_v10   ;;  %v2194_v33 = vmov 2  }
  0x98   : > { %v895_v37 = vpack.c.bf16 %v893_v35, %v893_v35  ;;  %v894_v38 = vpack.c.bf16 %v892_v36, %v892_v36  ;;  %v2091_v47 = vpack.i.bf16 %v1152_v44, %v1151_v43  ;;  %v1155_v35 = vunpack.c.l.bf16 %v2522_v32 }
  0x99   : > { %v1156_v36 = vunpack.c.h.bf16 %v2522_v32 }
  0x9a   : > { %1937 = vmatprep.subr.msk.bf16.mxu1 %vm463_vm3, %v895_v37  ;;  %v905_v40 = vsel %vm463_vm3, %v894_v38, 0 }
  0x9b   : > { %911 = vmatpush1.bf16.msra.mxu1 %v905_v40  ;;  %2092 = vrot.lane.b32.xlu1 %v2091_v47, %s2188_s16  ;;  %v2116_v37 = vpack.i.bf16 %v1156_v36, %v1155_v35 }
  0x9c   : > { %2102 = vrot.lane.b32.xlu0 %v2091_v47, %s2189_s17 }
  0x9d   : > { %2121 = vset.pattern.permute.xlu0 %v2194_v33 }
  0x9e   : > { %1938 = vmatmul.mubr.msk.bf16.vlgmr.msra.gmra.mrb[0].mxu1 %vm459_vm4, %v2463_v41 }
  0x9f   : > { %1919 = vmatmul.mubr.msk.bf16.vlgmr.msra.gmra.mrb[0].mxu0 %vm459_vm4, %v2380_v55  ;;  %994 = vmatprep.mubr.bf16.mxu1 %v2187_v3 }
  0xa0   : > { %596 = vmatpush1.bf16.msra.mxu0 %v590_v56  ;;  %627 = vmatprep.mubr.bf16.mxu0 %v2187_v3  ;;  %v2481_v48 = vpop.permute.xlu0 %854  ;;  %v2483_v50 = vpop.permute.xlu1 %859 }
  0xa1   : > { %1924 = vmatprep.subr.msk.bf16.mxu0 %vm463_vm3, %v652_v57  ;;  %2097 = vrot.lane.b32.xlu1 %v2091_v47, %s2190_s18 }
  0xa2   : > { %2112 = vrot.lane.b32.xlu0 %v2091_v47, %s2192_s20  ;;  %s1983_s20 = sshll.u32 %s2689_s11, 4 }
  0xa3   : > { %s2517_s28 = scalar_lea.vmem %s2686_s8, %s1983_s20  ;;  %s2632_s12 = scalar_lea.vmem %s2687_s9, %s1983_s20 }
  0xa5   : > { %2107 = vrot.lane.b32.xlu1 %v2091_v47, %s2191_s19 }
  0xa6   : > { %1092 = vperm.xlu0 %2121, %v2283_v5  }
  0xa9   : > { %2117 = vrot.lane.b32.xlu1 %v2116_v37, %s2191_s19 }
  0xab   : > { %1922 = vmatmul.mubr.msk.bf16.vlgmr.msra.gmra.mrb[0].mxu0 %vm459_vm4, %v2398_v62 }
  0xac   : > { %668 = vmatpush1.bf16.msra.mxu0 %v662_v1  ;;  %699 = vmatprep.mubr.bf16.mxu0 %v2187_v3 }
  0xad   : > { %1929 = vmatprep.subr.msk.bf16.mxu0 %vm463_vm3, %v1928_v2  ;;  %v1943_v2 = vcombine.high %v2286_v6, %v2286_v6  ;;  %v1972_v6 = vcombine.high %v2522_v32, %v2522_v32 }
  0xb7   : > { %1925 = vmatmul.mubr.msk.bf16.vlgmr.msra.gmra.mrb[0].mxu0 %vm459_vm4, %v2421_v16 }
  0xb8   : > { %734 = vmatpush1.bf16.msra.mxu0 %v728_v19  ;;  %765 = vmatprep.mubr.bf16.mxu0 %v2187_v3 }
  0xb9   : > { %1932 = vmatprep.subr.msk.bf16.mxu0 %vm463_vm3, %v790_v20 }
  0xc3   : > { %1930 = vmatmul.mubr.msk.bf16.vlgmr.msra.gmra.mrb[0].mxu0 %vm459_vm4, %v2439_v25 }
  0xc4   : > { %806 = vmatpush1.bf16.msra.mxu0 %v800_v26  ;;  %837 = vmatprep.mubr.bf16.mxu0 %v2187_v3 }
  0xcf   : > { %1933 = vmatmul.mubr.msk.bf16.vlgmr.msra.gmra.mrb[0].mxu0 %vm459_vm4, %v2452_v34 }
  0xd0   : > { %1595 = vmatprep.mubr.bf16.mxu0 %v2187_v3 }
 0x116   : > { %v2532_v38 = vpop.permute.xlu1 %1072  ;;  %v2534_v43 = vpop.permute.xlu0 %1076 }
 0x1a2   : > { %v839_v49 = vpop.f32.mrb[0].mxu0 }
 0x1a3   : > { %v841_v52 = vpop.f32.mrb[1].mxu0  ;;  %v862_v10 = vadd.f32 %v2481_v48, %v839_v49 }
 0x1a4   : > { %v843_v53 = vpop.f32.mrb[2].mxu0  ;;  %v863_v57 = vadd.f32 %v2481_v48, %v841_v52 }
 0x1a5   : > { %v864_v54 = vadd.f32 %v2483_v50, %v843_v53  ;;  %v845_v56 = vpop.f32.mrb[3].mxu0 }
 0x1a6   : > { %v865_v58 = vadd.f32 %v2483_v50, %v845_v56 }
 0x1a7   : > { %v1934_v60 = vmul.f32 -1.442695, %v864_v54  ;;  %v884_v61 = vpack.c.bf16 %v864_v54, %v862_v10 }
 0x1a8   : > { %v1935_v63 = vmul.f32 -1.442695, %v865_v58  ;;  %v885_v1 = vpack.c.bf16 %v865_v58, %v863_v57 }
 0x1a9   : > { %2139 = vpow2.f32 %v1934_v60 }
 0x1aa   : > { %2141 = vpow2.f32 %v1935_v63  ;;  %962 = vmatprep.subr.bf16.mxu1 %v885_v1 }
 0x1ab   : > { %963 = vmatpush1.bf16.msra.mxu1 %v884_v61  ;;  %2143 = vtanh.f32 %v862_v10  ;;  %v2093_v10 = vpop.permute.xlu1 %2092 }
 0x1ac   : > { %1944 = vmatprep.subr.msk.bf16.mxu1 %vm463_vm3, %v1943_v2  ;;  %2145 = vtanh.f32 %v863_v57  ;;  %v2095_v54 = vunpack.i.h.bf16 %v2093_v10  ;;  %v2094_v56 = vunpack.i.l.bf16 %v2093_v10 }
 0x1ae   : > { %1940 = vmatmul.mubr.msk.bf16.vlgmr.msra.gmra.mrb[0].mxu1 %vm958_vm7, %v2496_v9  ;;  %v1171_v58 = vsel %vm447_vm0, %v2094_v56, %v2095_v54  ;;  %v1172_v60 = vsel %vm447_vm0, %v2095_v54, %v2094_v56 }
 0x1af   : > { %1025 = vmatpush1.bf16.msra.mxu1 %v1019_v13  ;;  %1056 = vmatprep.mubr.bf16.mxu1 %v2187_v3  ;;  %v2098_v57 = vpop.permute.xlu1 %2097  ;;  %v1174_v13 = vmul.f32 %v2309_v17, %v1171_v58 }
 0x1b0   : > { %v2100_v61 = vunpack.i.h.bf16 %v2098_v57  ;;  %v2099_v63 = vunpack.i.l.bf16 %v2098_v57 }
 0x1b2   : > { %v1162_v17 = vsel %vm436_vm2, %v2100_v61, %v2099_v63 }
 0x1b3   : > { %v2140_v14 = vpop.eup %2139 }
 0x1b4   : > { %v2142_v15 = vpop.eup %2141  ;;  %v874_v19 = vadd.f32 1.0, %v2140_v14  ;;  %v1173_v14 = vmul.f32 %v2314_v18, %v1172_v60 }
 0x1b5   : > { %v875_v20 = vadd.f32 1.0, %v2142_v15  ;;  %v2144_v0 = vpop.eup %2143 }
 0x1b6   : > { %2147 = vrcp.f32 %v874_v19  ;;  %v2146_v24 = vpop.eup %2145 }
 0x1b7   : > { %2149 = vrcp.f32 %v875_v20  ;;  %v1161_v20 = vsel %vm436_vm2, %v2099_v63, %v2100_v61 }
 0x1b8   : > { %v1164_v33 = vmul.f32 %v1161_v20, %v2333_v28  ;;  %v1958_v20 = vcombine.low %v2470_v42, %v2470_v42 }
 0x1ba   : > { %1945 = vmatmul.mubr.msk.bf16.vlgmr.msra.gmra.mrb[0].mxu1 %vm459_vm4, %v2506_v21  ;;  %v1166_v28 = vpack.c.bf16 %v1164_v33, %v1164_v33 }
 0x1bb   : > { %1136 = vmatprep.mubr.bf16.mxu1 %v2187_v3 }
 0x1c0   : > { %v2148_v26 = vpop.eup %2147 }
 0x1c1   : > { %v2150_v27 = vpop.eup %2149  ;;  %v880_v29 = vmul.f32 %v2148_v26, %v2144_v0 }
 0x1c2   : > { %v881_v30 = vmul.f32 %v2150_v27, %v2146_v24  ;;  %v2103_v24 = vpop.permute.xlu0 %2102 }
 0x1c3   : > { %882 = vst [vmem:[%s2517_s28] sm:$0xff] %v880_v29  ;;  %v1176_v29 = vpack.c.bf16 %v1174_v13, %v1174_v13  ;;  %v2104_v18 = vunpack.i.l.bf16 %v2103_v24 }
 0x1c4   : > { %883 = vst [vmem:[%s2517_s28 + $0x8] sm:$0xff] %v881_v30  ;;  %v1175_v30 = vpack.c.bf16 %v1173_v14, %v1173_v14  ;;  %v1959_v14 = vcombine.high %v2470_v42, %v2470_v42 }
 0x28d   : > { %v1058_v40 = vpop.f32.mrb[0].mxu1 }
 0x28e   : > { %v1079_v44 = vadd.f32 %v2532_v38, %v1058_v40  ;;  %v1060_v45 = vpop.f32.mrb[1].mxu1  ;;  %v2105_v40 = vunpack.i.h.bf16 %v2103_v24  ;;  %v1407_v24 = vsel %vm463_vm3, %v1958_v20, 0 }
 0x28f   : > { %v1080_v47 = vadd.f32 %v2532_v38, %v1060_v45  ;;  %v1062_v49 = vpop.f32.mrb[2].mxu1  ;;  %v1178_v45 = vsel %vm463_vm3, %v1175_v30, 0 }
 0x290   : > { %2151 = vtanh.f32 %v1079_v44  ;;  %v1081_v5 = vadd.f32 %v2534_v43, %v1062_v49  ;;  %v1064_v52 = vpop.f32.mrb[3].mxu1  ;;  %v2556_v44 = vld [vmem:[%s2684_s6] sm:$0xf]  ;;  %v1279_v49 = vsel %vm574_vm1, %v2104_v18, %v2105_v40 }
 0x291   : > { %2153 = vtanh.f32 %v1080_v47  ;;  %v1082_v53 = vadd.f32 %v2534_v43, %v1064_v52  ;;  %v1163_v47 = vmul.f32 %v1162_v17, %v2338_v31  ;;  %v1282_v52 = vmul.f32 %v2323_v23, %v1279_v49 }
 0x292   : > { %2155 = vtanh.f32 %v1081_v5  ;;  %v1280_v31 = vsel %vm574_vm1, %v2105_v40, %v2104_v18 }
 0x293   : > { %2157 = vtanh.f32 %v1082_v53  ;;  %v1165_v5 = vpack.c.bf16 %v1163_v47, %v1163_v47  ;;  %v2108_v53 = vpop.permute.xlu1 %2107  ;;  %v1284_v54 = vpack.c.bf16 %v1282_v52, %v1282_v52  ;;  %v1281_v58 = vmul.f32 %v2359_v46, %v1280_v31 }
 0x294   : > { %v2110_v56 = vunpack.i.h.bf16 %v2108_v53  ;;  %v2109_v57 = vunpack.i.l.bf16 %v2108_v53 }
 0x295   : > { %v1227_v10 = vsel %vm463_vm3, %v1165_v5, 0  ;;  %v1283_v60 = vpack.c.bf16 %v1281_v58, %v1281_v58 }
 0x296   : > { %v1342_v23 = vsel %vm646_vm5, %v2109_v57, %v2110_v56 }
 0x297   : > { %v1345_v61 = vmul.f32 %v2372_v51, %v1342_v23  ;;  %v1286_v63 = vsel %vm463_vm3, %v1283_v60, 0 }
 0x29a   : > { %v2152_v1 = vpop.eup %2151 }
 0x29b   : > { %v2154_v2 = vpop.eup %2153 }
 0x29c   : > { %v2156_v4 = vpop.eup %2155 }
 0x29d   : > { %v2158_v15 = vpop.eup %2157  ;;  %v1087_v19 = vmul.f32 %v2156_v4, %v2152_v1  ;;  %v1347_v1 = vpack.c.bf16 %v1345_v61, %v1345_v61  ;;  %v2113_v4 = vpop.permute.xlu0 %2112 }
 0x29e   : > { %v1088_v0 = vmul.f32 %v2158_v15, %v2154_v2  ;;  %v1343_v2 = vsel %vm646_vm5, %v2110_v56, %v2109_v57  ;;  %v2115_v15 = vunpack.i.h.bf16 %v2113_v4 }
 0x29f   : > { %v1089_v26 = vpack.c.bf16 %v1087_v19, %v1087_v19  ;;  %v2114_v19 = vunpack.i.l.bf16 %v2113_v4 }
 0x2a0   : > { %v1090_v27 = vpack.c.bf16 %v1088_v0, %v1088_v0 }
 0x2a1   : > { %v1099_v37 = vsel %vm463_vm3, %v1089_v26, 0  ;;  %v2624_v18 = vpop.permute.xlu0 %1092 }
 0x2a2   : > { %1946 = vmatprep.subr.msk.bf16.mxu1 %vm463_vm3, %v1090_v27  ;;  %v1463_v27 = vsel %vm784_vm6, %v2114_v19, %v2115_v15 }
 0x2a3   : > { %1105 = vmatpush1.bf16.msra.mxu1 %v1099_v37 }
 0x2a4   : > { %1950 = vmatprep.subr.msk.bf16.mxu1 %vm463_vm3, %v1176_v29 }
 0x2a6   : > { %1947 = vmatmul.mubr.msk.bf16.vlgmr.msra.gmra.mrb[4].mxu1 %vm459_vm4, %v2556_v44 }
 0x2a7   : > { %1184 = vmatpush1.bf16.msra.mxu1 %v1178_v45  ;;  %1215 = vmatprep.mubr.bf16.mxu1 %v2187_v3 }
 0x2a8   : > { %1952 = vmatprep.subr.msk.bf16.mxu1 %vm463_vm3, %v1166_v28 }
 0x2ae   : > { %1951 = vmatmul.mubr.msk.bf16.vlgmr.msra.gmra.mrb[8].mxu1 %vm459_vm4, %v2351_v39  ;;  %v1344_v39 = vmul.f32 %v2388_v59, %v1343_v2 }
 0x2af   : > { %1233 = vmatpush1.bf16.msra.mxu1 %v1227_v10  ;;  %1264 = vmatprep.mubr.bf16.mxu1 %v2187_v3 }
 0x2b0   : > { %1954 = vmatprep.subr.msk.bf16.mxu1 %vm463_vm3, %v1284_v54  ;;  %v1346_v46 = vpack.c.bf16 %v1344_v39, %v1344_v39 }
 0x2b2   : > { %v1349_v13 = vsel %vm463_vm3, %v1346_v46, 0 }
 0x2ba   : > { %1953 = vmatmul.mubr.msk.bf16.vlgmr.msra.gmra.mrb[8].mxu1 %vm459_vm4, %v2380_v55  ;;  %v1464_v55 = vsel %vm784_vm6, %v2115_v15, %v2114_v19 }
 0x2bb   : > { %1292 = vmatpush1.bf16.msra.mxu1 %v1286_v63  ;;  %1323 = vmatprep.mubr.bf16.mxu1 %v2187_v3  ;;  %v1466_v0 = vmul.f32 %v2411_v11, %v1464_v55  ;;  %v2118_v11 = vpop.permute.xlu1 %2117 }
 0x2bc   : > { %1956 = vmatprep.subr.msk.bf16.mxu1 %vm463_vm3, %v1347_v1  ;;  %v2119_v30 = vunpack.i.l.bf16 %v2118_v11 }
 0x2bd   : > { %v1468_v26 = vpack.c.bf16 %v1466_v0, %v1466_v0 }
 0x2c6   : > { %1955 = vmatmul.mubr.msk.bf16.vlgmr.msra.gmra.mrb[8].mxu1 %vm459_vm4, %v2398_v62  ;;  %v1465_v62 = vmul.f32 %v2429_v22, %v1463_v27 }
 0x2c7   : > { %1355 = vmatpush1.bf16.msra.mxu1 %v1349_v13  ;;  %1386 = vmatprep.mubr.bf16.mxu1 %v2187_v3 }
 0x2c8   : > { %1960 = vmatprep.subr.msk.bf16.mxu1 %vm463_vm3, %v1959_v14  ;;  %v1467_v29 = vpack.c.bf16 %v1465_v62, %v1465_v62 }
 0x2ca   : > { %v1470_v42 = vsel %vm463_vm3, %v1467_v29, 0 }
 0x2d2   : > { %1957 = vmatmul.mubr.msk.bf16.vlgmr.msra.gmra.mrb[8].mxu1 %vm459_vm4, %v2421_v16  ;;  %v2120_v16 = vunpack.i.h.bf16 %v2118_v11 }
 0x2d3   : > { %1413 = vmatpush1.bf16.msra.mxu1 %v1407_v24  ;;  %1444 = vmatprep.mubr.bf16.mxu1 %v2187_v3 }
 0x2d4   : > { %1962 = vmatprep.subr.msk.bf16.mxu1 %vm463_vm3, %v1468_v26  ;;  %v1551_v33 = vsel %vm646_vm5, %v2119_v30, %v2120_v16  ;;  %v1552_v22 = vsel %vm646_vm5, %v2120_v16, %v2119_v30 }
 0x2d5   : > { %v1554_v37 = vmul.f32 %v2372_v51, %v1551_v33 }
 0x2d7   : > { %v1556_v17 = vpack.c.bf16 %v1554_v37, %v1554_v37 }
 0x2d9   : > { %1968 = vmatprep.subr.msk.bf16.mxu0 %vm463_vm3, %v1556_v17 }
 0x2de   : > { %1961 = vmatmul.mubr.msk.bf16.vlgmr.msra.gmra.mrb[8].mxu1 %vm459_vm4, %v2439_v25  ;;  %v1553_v25 = vmul.f32 %v2388_v59, %v1552_v22 }
 0x2df   : > { %1476 = vmatpush1.bf16.msra.mxu1 %v1470_v42  ;;  %1507 = vmatprep.mubr.bf16.mxu1 %v2187_v3 }
 0x2e0   : > { %v1555_v40 = vpack.c.bf16 %v1553_v25, %v1553_v25 }
 0x2ea   : > { %1963 = vmatmul.mubr.msk.bf16.vlgmr.msra.gmra.mrb[8].mxu1 %vm459_vm4, %v2452_v34  ;;  %v1558_v34 = vsel %vm463_vm3, %v1555_v40, 0 }
 0x2eb   : > { %1564 = vmatpush1.bf16.msra.mxu0 %v1558_v34 }
 0x2ee   : > { %1969 = vmatmul.mubr.msk.bf16.vlgmr.msra.gmra.mrb[4].mxu0 %vm459_vm4, %v2463_v41 }
 0x2ef   : > { %1638 = vmatprep.mubr.bf16.mxu0 %v2187_v3 }
 0x379   : > { %v1138_v12 = vpop.f32.mrb[4].mxu1 }
 0x37a   : > { %v1139_v45 = vadd.f32 %v1138_v12, %v2624_v18  ;;  %v1140_v51 = vpop.f32.mrb[5].mxu1 }
 0x37b   : > { %v1141_v59 = vadd.f32 %v1140_v51, %v2624_v18  ;;  %v1142_v28 = vpop.f32.mrb[6].mxu1 }
 0x37c   : > { %v1145_v41 = vadd.f32 %v1139_v45, %v428_v7  ;;  %v1143_v47 = vpop.f32.mrb[7].mxu1 }
 0x37d   : > { %v1146_v49 = vadd.f32 %v1141_v59, %v429_v8  ;;  %v1971_v8 = vcombine.low %v2522_v32, %v2522_v32 }
 0x37e   : > { %1147 = vst [vmem:[%s2632_s12] sm:$0xff] %v1145_v41 }
 0x37f   : > { %1148 = vst [vmem:[%s2632_s12 + $0x8] sm:$0xff] %v1146_v49 }
 0x3bd   : > { %v1509_v5 = vpop.f32.mrb[8].mxu1 }
 0x3be   : > { %v1511_v52 = vpop.f32.mrb[9].mxu1  ;;  %v1522_v10 = vadd.f32 %v1509_v5, %v2481_v48 }
 0x3bf   : > { %v1513_v53 = vpop.f32.mrb[10].mxu1  ;;  %v1523_v56 = vadd.f32 %v1511_v52, %v2481_v48  ;;  %v1655_v48 = vsel %vm463_vm3, %v1971_v8, 0 }
 0x3c0   : > { %v1524_v54 = vadd.f32 %v1513_v53, %v2483_v50  ;;  %v1515_v31 = vpop.f32.mrb[11].mxu1 }
 0x3c1   : > { %v1525_v57 = vadd.f32 %v1515_v31, %v2483_v50 }
 0x3c2   : > { %v1964_v58 = vmul.f32 -1.442695, %v1524_v54  ;;  %v1545_v7 = vpack.c.bf16 %v1524_v54, %v1522_v10 }
 0x3c3   : > { %v1965_v23 = vmul.f32 -1.442695, %v1525_v57  ;;  %v1546_v60 = vpack.c.bf16 %v1525_v57, %v1523_v56 }
 0x3c4   : > { %2159 = vpow2.f32 %v1964_v58 }
 0x3c5   : > { %2161 = vpow2.f32 %v1965_v23  ;;  %1606 = vmatprep.subr.bf16.mxu0 %v1546_v60 }
 0x3c6   : > { %1607 = vmatpush1.bf16.msra.mxu0 %v1545_v7  ;;  %2163 = vtanh.f32 %v1522_v10 }
 0x3c7   : > { %1973 = vmatprep.subr.msk.bf16.mxu0 %vm463_vm3, %v1972_v6  ;;  %2165 = vtanh.f32 %v1523_v56 }
 0x3c9   : > { %1970 = vmatmul.mubr.msk.bf16.vlgmr.msra.gmra.mrb[4].mxu0 %vm958_vm7, %v2496_v9 }
 0x3ca   : > { %1661 = vmatpush1.bf16.msra.mxu0 %v1655_v48  ;;  %1692 = vmatprep.mubr.bf16.mxu0 %v2187_v3 }
 0x3ce   : > { %v2160_v50 = vpop.eup %2159 }
 0x3cf   : > { %v2162_v61 = vpop.eup %2161  ;;  %v1534_v63 = vadd.f32 1.0, %v2160_v50 }
 0x3d0   : > { %v1535_v1 = vadd.f32 1.0, %v2162_v61  ;;  %v2164_v2 = vpop.eup %2163 }
 0x3d1   : > { %2167 = vrcp.f32 %v1534_v63  ;;  %v2166_v9 = vpop.eup %2165 }
 0x3d2   : > { %2169 = vrcp.f32 %v1535_v1 }
 0x3d5   : > { %1974 = vmatmul.mubr.msk.bf16.vlgmr.msra.gmra.mrb[4].mxu0 %vm459_vm4, %v2506_v21 }
 0x3d6   : > { %1757 = vmatprep.mubr.bf16.mxu0 %v2187_v3 }
 0x3db   : > { %v2168_v39 = vpop.eup %2167 }
 0x3dc   : > { %v2170_v46 = vpop.eup %2169  ;;  %v1540_v4 = vmul.f32 %v2168_v39, %v2164_v2 }
 0x3dd   : > { %v1541_v13 = vmul.f32 %v2170_v46, %v2166_v9 }
 0x3de   : > { %1966 = vst [vmem:[%s2517_s28 + $0x10] sm:$0xff] %v1540_v4 }
 0x3df   : > { %1967 = vst [vmem:[%s2517_s28 + $0x18] sm:$0xff] %v1541_v13 }
 0x4a8   : > { %v1694_v14 = vpop.f32.mrb[4].mxu0 }
 0x4a9   : > { %v1707_v15 = vadd.f32 %v1694_v14, %v2532_v38  ;;  %v1696_v19 = vpop.f32.mrb[5].mxu0 }
 0x4aa   : > { %v1708_v55 = vadd.f32 %v1696_v19, %v2532_v38  ;;  %v1698_v20 = vpop.f32.mrb[6].mxu0 }
 0x4ab   : > { %2171 = vtanh.f32 %v1707_v15  ;;  %v1709_v21 = vadd.f32 %v1698_v20, %v2534_v43  ;;  %v1700_v0 = vpop.f32.mrb[7].mxu0 }
 0x4ac   : > { %2173 = vtanh.f32 %v1708_v55  ;;  %v1710_v3 = vadd.f32 %v1700_v0, %v2534_v43 }
 0x4ad   : > { %2175 = vtanh.f32 %v1709_v21 }
 0x4ae   : > { %2177 = vtanh.f32 %v1710_v3 }
 0x4b5   : > { %v2172_v24 = vpop.eup %2171 }
 0x4b6   : > { %v2174_v26 = vpop.eup %2173 }
 0x4b7   : > { %v2176_v27 = vpop.eup %2175 }
 0x4b8   : > { %v2178_v62 = vpop.eup %2177  ;;  %v1715_v29 = vmul.f32 %v2176_v27, %v2172_v24 }
 0x4b9   : > { %v1716_v42 = vmul.f32 %v2178_v62, %v2174_v26 }
 0x4ba   : > { %v1717_v11 = vpack.c.bf16 %v1715_v29, %v1715_v29 }
 0x4bb   : > { %v1718_v38 = vpack.c.bf16 %v1716_v42, %v1716_v42 }
 0x4bc   : > { %v1720_v16 = vsel %vm463_vm3, %v1717_v11, 0 }
 0x4bd   : > { %1975 = vmatprep.subr.msk.bf16.mxu0 %vm463_vm3, %v1718_v38 }
 0x4be   : > { %1726 = vmatpush1.bf16.msra.mxu0 %v1720_v16 }
 0x4c1   : > { %1976 = vmatmul.mubr.msk.bf16.vlgmr.msra.gmra.mrb[8].mxu0 %vm459_vm4, %v2556_v44 }
 0x594   : > { %v1759_v43 = vpop.f32.mrb[8].mxu0 }
 0x595   : > { %v1760_v30 = vadd.f32 %v1759_v43, %v2624_v18  ;;  %v1761_v33 = vpop.f32.mrb[9].mxu0 }
 0x596   : > { %v1762_v22 = vadd.f32 %v1761_v33, %v2624_v18  ;;  %v1763_v37 = vpop.f32.mrb[10].mxu0 }
 0x597   : > { %v1766_v25 = vadd.f32 %v1760_v30, %v1155_v35  ;;  %v1764_v17 = vpop.f32.mrb[11].mxu0 }
 0x598   : > { %v1767_v40 = vadd.f32 %v1762_v22, %v1156_v36 }
 0x599   : > { %1977 = vst [vmem:[%s2632_s12 + $0x10] sm:$0xff] %v1766_v25 }
 0x59a   : > { %1978 = vst [vmem:[%s2632_s12 + $0x18] sm:$0xff] %v1767_v40 }
 0x59b PF: > { %s20_s30 = sadd.s32 1, %s2185_s30  }
 0x59c   : > { %p17_p4 = scmp.ge.s32.totalorder %s20_s30, 4  }
 0x59e   :  { %19 = sbr.rel (!%p17_p4) target bundleno = 1 (0x1), region = 111 }

</bundles_post_ra>
